<compile_context>
chip_gen: v5e
topology: v5e:2x2
jax: 0.10.0
libtpu: 0.0.40
codegen_flags: <defaults>
</compile_context>

<pallas_src>
import functools

import jax
import jax.numpy as jnp
from jax.experimental import pallas as pl
from jax.experimental.pallas import tpu as pltpu


# --------------------------------------------------------------------------
# Kernel 1: policy log-likelihood, batch-on-lanes layout.
#   state_ref : [S, TB] f32      w*_ref : [out, in] f32     b*_ref : [out, 1]
#   act_ref   : [K, TB] int32    out_ref: [K, TB] f32  (log p(action | state))
# --------------------------------------------------------------------------
def policy_loglik_kernel(state_ref, act_ref, w1_ref, b1_ref, w2_ref, b2_ref,
                         w3_ref, b3_ref, out_ref):
    x = state_ref[...]                                                  # [S, TB]

    # MLP hot path: w @ x keeps batch on the 128-lane axis end-to-end.
    h1 = jnp.maximum(
        jnp.dot(w1_ref[...], x, preferred_element_type=jnp.float32) + b1_ref[...], 0.0)
    h2 = jnp.maximum(
        jnp.dot(w2_ref[...], h1, preferred_element_type=jnp.float32) + b2_ref[...], 0.0)
    logits = jnp.dot(w3_ref[...], h2, preferred_element_type=jnp.float32) + b3_ref[...]
    # logits: [A, TB]

    # Fused log-softmax + gather (over the tiny sublane axis A).
    a_dim, tb = logits.shape
    m = jnp.max(logits, axis=0, keepdims=True)                          # [1, TB]
    z = logits - m                                                      # [A, TB]
    lse = jnp.log(jnp.sum(jnp.exp(z), axis=0, keepdims=True))           # [1, TB]

    act = act_ref[...]                                                  # [K, TB] int32
    k_dim = act.shape[0]
    row_ids = jax.lax.broadcasted_iota(jnp.int32, (a_dim, tb), 0)       # hoisted once

    cols = []
    for k in range(k_dim):                                              # K tiny & static
        mask = row_ids == act[k:k + 1, :]                               # [A, TB]
        z_sel = jnp.sum(jnp.where(mask, z, 0.0), axis=0, keepdims=True) # [1, TB]
        cols.append(z_sel - lse)                                        # log-softmax gather

    # Single lane-dense store.
    out_ref[...] = cols[0] if k_dim == 1 else jnp.concatenate(cols, axis=0)


# --------------------------------------------------------------------------
# Kernel 2: PG loss reduction.
#   loss += -sum(cumulative_rollout * loglik)  per tile; scaled on last step.
# --------------------------------------------------------------------------
def pg_dot_kernel(roll_ref, ll_ref, o_ref, *, scale):
    @pl.when(pl.program_id(0) == 0)
    def _():
        o_ref[...] = jnp.zeros_like(o_ref)

    # A_hat = -cumulative_rollout
    o_ref[...] = o_ref[...] - jnp.sum(roll_ref[...] * ll_ref[...], keepdims=True)

    @pl.when(pl.program_id(0) == pl.num_programs(0) - 1)
    def _():
        o_ref[...] = o_ref[...] * scale


# --------------------------------------------------------------------------
# Wrapper
# --------------------------------------------------------------------------
def pg_loss(state, action, cumulative_rollout, params, *,
            trajectory_length, simulations, tb=1024):
    """Returns (loss_scalar, loglik[B, K])."""
    w1, b1, w2, b2, w3, b3 = params
    B, S = state.shape
    K = action.shape[1]
    H = w1.shape[1]
    A = w3.shape[1]

    # Pick batch tile / padded batch so tiles are lane-aligned and divide Bp.
    if B <= tb:
        TB, Bp = B, B
    else:
        TB = tb
        Bp = ((B + TB - 1) // TB) * TB

    # Batch-on-lanes layout (features on sublanes, batch on the 128-lane axis).
    state_t = state.T                                   # [S, B]
    act_t = action.T.astype(jnp.int32)                  # [K, B]
    roll_t = cumulative_rollout.reshape(B, K).T         # [K, B]
    if Bp != B:
        pad = Bp - B
        state_t = jnp.pad(state_t, ((0, 0), (0, pad)))
        act_t = jnp.pad(act_t, ((0, 0), (0, pad)))      # pad with valid index 0
        roll_t = jnp.pad(roll_t, ((0, 0), (0, pad)))    # zero advantage -> no effect

    # Weights stored [out, in] (torch layout) so the kernel computes w @ x.
    w1_t, w2_t, w3_t = w1.T, w2.T, w3.T
    b1_c, b2_c, b3_c = b1.reshape(H, 1), b2.reshape(H, 1), b3.reshape(A, 1)

    grid = (Bp // TB,)

    def batch_spec(rows):
        return pl.BlockSpec((rows, TB), lambda i: (0, i))

    def const_spec(shape):
        return pl.BlockSpec(shape, lambda i: (0, 0))    # VMEM-resident across tiles

    loglik_t = pl.pallas_call(
        policy_loglik_kernel,
        out_shape=jax.ShapeDtypeStruct((K, Bp), jnp.float32),
        grid=grid,
        in_specs=[
            batch_spec(S),                              # state   [S, Bp]
            batch_spec(K),                              # action  [K, Bp]
            const_spec((H, S)), const_spec((H, 1)),     # w1, b1
            const_spec((H, H)), const_spec((H, 1)),     # w2, b2
            const_spec((A, H)), const_spec((A, 1)),     # w3, b3
        ],
        out_specs=batch_spec(K),
        compiler_params=pltpu.CompilerParams(
            dimension_semantics=("parallel",),          # megacore on v7x
            vmem_limit_bytes=32 * 1024 * 1024),         # safe on v5e/v6e/v7x
    )(state_t, act_t, w1_t, b1_c, w2_t, b2_c, w3_t, b3_c)

    scale = 1.0 / (float(trajectory_length) * float(simulations))
    loss = pl.pallas_call(
        functools.partial(pg_dot_kernel, scale=scale),
        out_shape=jax.ShapeDtypeStruct((1, 1), jnp.float32),
        grid=grid,
        in_specs=[batch_spec(K), batch_spec(K)],
        out_specs=pl.BlockSpec((1, 1), lambda i: (0, 0)),
        compiler_params=pltpu.CompilerParams(
            dimension_semantics=("arbitrary",)),        # accumulator across tiles
    )(roll_t, loglik_t)

    return loss[0, 0], loglik_t[:, :B].T                # scalar, [B, K]


def init_linear_params(key, in_features, out_features):
    """torch.nn.Linear-style init. Weight stored [in, out]; bias [1, out]."""
    kw, kb = jax.random.split(key)
    bound = 1.0 / jnp.sqrt(jnp.float32(in_features))
    w = jax.random.uniform(kw, (in_features, out_features), jnp.float32, -bound, bound)
    b = jax.random.uniform(kb, (1, out_features), jnp.float32, -bound, bound)
    return w, b


if __name__ == "__main__":
    # CartPole-like sizes: state_size=4, hidden=32, actions=2
    state_size, hidden, actions = 4, 32, 2
    trajectory_length, simulations = 32, 8
    batch, K = trajectory_length * simulations, 1       # 256 (state, action) rows

    key = jax.random.PRNGKey(0)
    k_state, k_act, k_roll, k1, k2, k3 = jax.random.split(key, 6)

    state = jax.random.normal(k_state, (batch, state_size), jnp.float32)
    action = jax.random.randint(k_act, (batch, K), 0, actions, jnp.int32)
    cumulative_rollout = jax.random.normal(k_roll, (batch, K), jnp.float32)

    w1, b1 = init_linear_params(k1, state_size, hidden)
    w2, b2 = init_linear_params(k2, hidden, hidden)
    w3, b3 = init_linear_params(k3, hidden, actions)
    params = (w1, b1, w2, b2, w3, b3)

    # tb=128 so the demo exercises a 2-step batch grid.
    loss, loglik = pg_loss(state, action, cumulative_rollout, params,
                           trajectory_length=trajectory_length,
                           simulations=simulations, tb=128)
    loss, loglik = jax.block_until_ready((loss, loglik))

    # Pure-JAX reference
    h1 = jax.nn.relu(state @ w1 + b1)
    h2 = jax.nn.relu(h1 @ w2 + b2)
    logits = h2 @ w3 + b3
    logp = jax.nn.log_softmax(logits, axis=1)
    ref_ll = jnp.take_along_axis(logp, action, axis=1)
    ref_loss = (jnp.dot(-cumulative_rollout.reshape(-1), ref_ll.reshape(-1))
                / trajectory_length / simulations)

    assert jnp.allclose(loglik, ref_ll, atol=3e-5, rtol=1e-5), (loglik, ref_ll)
    assert jnp.allclose(loss, ref_loss, atol=3e-5, rtol=1e-5), (loss, ref_loss)

    print("KERNEL_OK")
</pallas_src>

<mosaic_0001>
module attributes {stable_mosaic.version = 11 : i64} {
  func.func @policy_loglik_kernel(%arg0: i32, %arg1: memref<4x128xf32, #tpu.memory_space<vmem>>, %arg2: memref<1x128xi32, #tpu.memory_space<vmem>>, %arg3: memref<32x4xf32, #tpu.memory_space<vmem>>, %arg4: memref<32x1xf32, #tpu.memory_space<vmem>>, %arg5: memref<32x32xf32, #tpu.memory_space<vmem>>, %arg6: memref<32x1xf32, #tpu.memory_space<vmem>>, %arg7: memref<2x32xf32, #tpu.memory_space<vmem>>, %arg8: memref<2x1xf32, #tpu.memory_space<vmem>>, %arg9: memref<1x128xf32, #tpu.memory_space<vmem>>) attributes {dimension_semantics = [#tpu.dimension_semantics<parallel>], iteration_bounds = array<i64: 2>, scalar_prefetch = 0 : i64, scratch_operands = 0 : i64, tpu.core_type = #tpu.core_type<tc>, window_params = [{transform_indices = @transform_0, window_bounds = array<i64: 4, 128>}, {transform_indices = @transform_1, window_bounds = array<i64: 1, 128>}, {pipeline_mode = #tpu.pipeline_mode<synchronous>, transform_indices = @transform_2, window_bounds = array<i64: 32, 4>}, {pipeline_mode = #tpu.pipeline_mode<synchronous>, transform_indices = @transform_3, window_bounds = array<i64: 32, 1>}, {pipeline_mode = #tpu.pipeline_mode<synchronous>, transform_indices = @transform_4, window_bounds = array<i64: 32, 32>}, {pipeline_mode = #tpu.pipeline_mode<synchronous>, transform_indices = @transform_5, window_bounds = array<i64: 32, 1>}, {pipeline_mode = #tpu.pipeline_mode<synchronous>, transform_indices = @transform_6, window_bounds = array<i64: 2, 32>}, {pipeline_mode = #tpu.pipeline_mode<synchronous>, transform_indices = @transform_7, window_bounds = array<i64: 2, 1>}, {transform_indices = @transform_8, window_bounds = array<i64: 1, 128>}]} {
    %c0 = arith.constant 0 : index
    %c0_0 = arith.constant 0 : index
    %0 = vector.load %arg1[%c0, %c0_0] : memref<4x128xf32, #tpu.memory_space<vmem>>, vector<4x128xf32>
    %c0_1 = arith.constant 0 : index
    %c0_2 = arith.constant 0 : index
    %1 = vector.load %arg3[%c0_1, %c0_2] : memref<32x4xf32, #tpu.memory_space<vmem>>, vector<32x4xf32>
    %cst = arith.constant dense<0.000000e+00> : vector<32x128xf32>
    %2 = tpu.matmul %1, %0, %cst {dimension_numbers = #tpu.dot_dimension_numbers<[1], [0], [0], [1], [0, 0, 1, 1], [], []>} : vector<32x4xf32>, vector<4x128xf32>, vector<32x128xf32> -> vector<32x128xf32>
    %c0_3 = arith.constant 0 : index
    %c0_4 = arith.constant 0 : index
    %3 = vector.load %arg4[%c0_3, %c0_4] : memref<32x1xf32, #tpu.memory_space<vmem>>, vector<32x1xf32>
    %4 = vector.broadcast %3 : vector<32x1xf32> to vector<32x128xf32>
    %5 = arith.addf %2, %4 : vector<32x128xf32>
    %cst_5 = arith.constant 0.000000e+00 : f32
    %6 = vector.broadcast %cst_5 : f32 to vector<32x128xf32>
    %7 = arith.maximumf %5, %6 : vector<32x128xf32>
    %c0_6 = arith.constant 0 : index
    %c0_7 = arith.constant 0 : index
    %8 = vector.load %arg5[%c0_6, %c0_7] : memref<32x32xf32, #tpu.memory_space<vmem>>, vector<32x32xf32>
    %cst_8 = arith.constant dense<0.000000e+00> : vector<32x128xf32>
    %9 = tpu.matmul %8, %7, %cst_8 {dimension_numbers = #tpu.dot_dimension_numbers<[1], [0], [0], [1], [0, 0, 1, 1], [], []>} : vector<32x32xf32>, vector<32x128xf32>, vector<32x128xf32> -> vector<32x128xf32>
    %c0_9 = arith.constant 0 : index
    %c0_10 = arith.constant 0 : index
    %10 = vector.load %arg6[%c0_9, %c0_10] : memref<32x1xf32, #tpu.memory_space<vmem>>, vector<32x1xf32>
    %11 = vector.broadcast %10 : vector<32x1xf32> to vector<32x128xf32>
    %12 = arith.addf %9, %11 : vector<32x128xf32>
    %cst_11 = arith.constant 0.000000e+00 : f32
    %13 = vector.broadcast %cst_11 : f32 to vector<32x128xf32>
    %14 = arith.maximumf %12, %13 : vector<32x128xf32>
    %c0_12 = arith.constant 0 : index
    %c0_13 = arith.constant 0 : index
    %15 = vector.load %arg7[%c0_12, %c0_13] : memref<2x32xf32, #tpu.memory_space<vmem>>, vector<2x32xf32>
    %cst_14 = arith.constant dense<0.000000e+00> : vector<2x128xf32>
    %16 = tpu.matmul %15, %14, %cst_14 {dimension_numbers = #tpu.dot_dimension_numbers<[1], [0], [0], [1], [0, 0, 1, 1], [], []>} : vector<2x32xf32>, vector<32x128xf32>, vector<2x128xf32> -> vector<2x128xf32>
    %c0_15 = arith.constant 0 : index
    %c0_16 = arith.constant 0 : index
    %17 = vector.load %arg8[%c0_15, %c0_16] : memref<2x1xf32, #tpu.memory_space<vmem>>, vector<2x1xf32>
    %18 = vector.broadcast %17 : vector<2x1xf32> to vector<2x128xf32>
    %19 = arith.addf %16, %18 : vector<2x128xf32>
    %cst_17 = arith.constant dense<0xFF800000> : vector<128xf32>
    %20 = vector.multi_reduction <maximumf>, %19, %cst_17 [0] : vector<2x128xf32> to vector<128xf32>
    %21 = vector.shape_cast %20 : vector<128xf32> to vector<1x128xf32>
    %22 = vector.broadcast %21 : vector<1x128xf32> to vector<2x128xf32>
    %23 = arith.subf %19, %22 : vector<2x128xf32>
    %24 = math.exp %23 : vector<2x128xf32>
    %cst_18 = arith.constant dense<0.000000e+00> : vector<128xf32>
    %25 = vector.multi_reduction <add>, %24, %cst_18 [0] : vector<2x128xf32> to vector<128xf32>
    %26 = vector.shape_cast %25 : vector<128xf32> to vector<1x128xf32>
    %27 = math.log %26 : vector<1x128xf32>
    %c0_19 = arith.constant 0 : index
    %c0_20 = arith.constant 0 : index
    %28 = vector.load %arg2[%c0_19, %c0_20] : memref<1x128xi32, #tpu.memory_space<vmem>>, vector<1x128xi32>
    %29 = tpu.iota {dimensions = array<i32: 0>} : vector<2x128xi32>
    %30 = vector.broadcast %28 : vector<1x128xi32> to vector<2x128xi32>
    %31 = arith.cmpi eq, %29, %30 : vector<2x128xi32>
    %cst_21 = arith.constant 0.000000e+00 : f32
    %32 = vector.broadcast %cst_21 : f32 to vector<2x128xf32>
    %33 = arith.select %31, %23, %32 : vector<2x128xi1>, vector<2x128xf32>
    %cst_22 = arith.constant dense<0.000000e+00> : vector<128xf32>
    %34 = vector.multi_reduction <add>, %33, %cst_22 [0] : vector<2x128xf32> to vector<128xf32>
    %35 = vector.shape_cast %34 : vector<128xf32> to vector<1x128xf32>
    %36 = arith.subf %35, %27 : vector<1x128xf32>
    %c0_23 = arith.constant 0 : index
    %c0_24 = arith.constant 0 : index
    %37 = vector.load %arg9[%c0_23, %c0_24] : memref<1x128xf32, #tpu.memory_space<vmem>>, vector<1x128xf32>
    tpu.vector_store %arg9[%c0_23, %c0_24], %36 {strides = array<i32>} : memref<1x128xf32, #tpu.memory_space<vmem>>, vector<1x128xf32>,
    return
  }
  func.func @transform_0(%arg0: i32) -> (i32, i32) {
    %c0_i32 = arith.constant 0 : i32
    %c0_i32_0 = arith.constant 0 : i32
    return %c0_i32, %arg0 : i32, i32
  }
  func.func @transform_1(%arg0: i32) -> (i32, i32) {
    %c0_i32 = arith.constant 0 : i32
    %c0_i32_0 = arith.constant 0 : i32
    return %c0_i32, %arg0 : i32, i32
  }
  func.func @transform_2(%arg0: i32) -> (i32, i32) {
    %c0_i32 = arith.constant 0 : i32
    %c0_i32_0 = arith.constant 0 : i32
    %c0_i32_1 = arith.constant 0 : i32
    return %c0_i32, %c0_i32_0 : i32, i32
  }
  func.func @transform_3(%arg0: i32) -> (i32, i32) {
    %c0_i32 = arith.constant 0 : i32
    %c0_i32_0 = arith.constant 0 : i32
    %c0_i32_1 = arith.constant 0 : i32
    return %c0_i32, %c0_i32_0 : i32, i32
  }
  func.func @transform_4(%arg0: i32) -> (i32, i32) {
    %c0_i32 = arith.constant 0 : i32
    %c0_i32_0 = arith.constant 0 : i32
    %c0_i32_1 = arith.constant 0 : i32
    return %c0_i32, %c0_i32_0 : i32, i32
  }
  func.func @transform_5(%arg0: i32) -> (i32, i32) {
    %c0_i32 = arith.constant 0 : i32
    %c0_i32_0 = arith.constant 0 : i32
    %c0_i32_1 = arith.constant 0 : i32
    return %c0_i32, %c0_i32_0 : i32, i32
  }
  func.func @transform_6(%arg0: i32) -> (i32, i32) {
    %c0_i32 = arith.constant 0 : i32
    %c0_i32_0 = arith.constant 0 : i32
    %c0_i32_1 = arith.constant 0 : i32
    return %c0_i32, %c0_i32_0 : i32, i32
  }
  func.func @transform_7(%arg0: i32) -> (i32, i32) {
    %c0_i32 = arith.constant 0 : i32
    %c0_i32_0 = arith.constant 0 : i32
    %c0_i32_1 = arith.constant 0 : i32
    return %c0_i32, %c0_i32_0 : i32, i32
  }
  func.func @transform_8(%arg0: i32) -> (i32, i32) {
    %c0_i32 = arith.constant 0 : i32
    %c0_i32_0 = arith.constant 0 : i32
    return %c0_i32, %arg0 : i32, i32
  }
}

</mosaic_0001>

<bundles_post_ra>
// kernel: tpu_custom_call.1
= control target key start
LH: loop header
LB: loop body
LE: loop exit
PB: predicated region body
PF: predicated region fallthrough
CT: control target
= control target key end

     0   :  { %13 = vsyncpa [#allocation3], 0  ;;  %s952_s0 = inlined_call_operand.vmem [shape: f32[4,256], index: 0, kind: input, shape index: {}]   ;;  %s953_s1 = inlined_call_operand.vmem [shape: s32[1,256], index: 1, kind: input, shape index: {}]   ;;  %s954_s2 = inlined_call_operand.vmem [shape: f32[32,4], index: 2, kind: input, shape index: {}]   ;;  %s955_s3 = inlined_call_operand.vmem [shape: f32[32,1], index: 3, kind: input, shape index: {}]   ;;  %s956_s4 = inlined_call_operand.vmem [shape: f32[32,32], index: 4, kind: input, shape index: {}]   ;;  %s957_s5 = inlined_call_operand.vmem [shape: f32[32,1], index: 5, kind: input, shape index: {}]   ;;  %s958_s6 = inlined_call_operand.vmem [shape: f32[2,32], index: 6, kind: input, shape index: {}]   ;;  %s959_s7 = inlined_call_operand.vmem [shape: f32[2,1], index: 7, kind: input, shape index: {}]   ;;  %s960_s8 = inlined_call_operand.hbm [shape: f32[1,256], index: 8, kind: output, shape index: {}]  }
   0x1   :  { %15 = vsyncpa [#allocation3 + $0x1], 0  ;;  %s789_s27 = smov 0   ;;  %s791_s28 = smov 0  }
   0x2   :  { %s793_s29 = smov 0   ;;  %s795_s30 = smov 0  }
   0x3 LB: > { %s810_s9 = sadd.s32 4294967295, %s741_s30   ;;  %s609_s10 = sadd.s32 4294967294, %s741_s30   ;;  %s741_s30 = sphi %s795_s30, %s967_s30   ;;  %s737_s29 = sphi %s793_s29, %s966_s29   ;;  %s733_s28 = sphi %s791_s28, %s965_s28   ;;  %s729_s27 = sphi %s789_s27, %s964_s27  }
   0x4   : > { %s814_s11 = sadd.s32 1, %s741_s30   ;;  %s206_s12 = sadd.s32 1, %s737_s29 }
   0x5   : > { %s203_s13 = ssub.s32 %s741_s30, %s814_s11  ;;  %p216_p0 = scmp.ne.s32.totalorder %s737_s29, %s733_s28 }
   0x6   : > { %p204_p1 = scmp.eq.s32.totalorder %s203_s13, 0  ;;  %p217_p2 = scmp.eq.s32.totalorder %s810_s9, 1 }
   0x7   : > { %p222_p3 = scmp.ne.s32.totalorder %s733_s28, %s729_s27  ;;  %p223_p4 = scmp.eq.s32.totalorder %s609_s10, 1 }
   0x8   : > { %s825_s14 = scalar_select %p204_p1, %s737_s29, %s206_s12  }
   0x9   : > { %p827_p5 = por %p217_p2, %p216_p0  ;;  %p831_p6 = por %p223_p4, %p222_p3 }
   0xa   : > { %p612_p7 = scmp.ge.s32.totalorder %s741_s30, 1  ;;  %p272_p8 = scmp.lt.s32.totalorder %s741_s30, 3 }
   0xc   : > { %p273_p9 = pnand %p612_p7, %p272_p8 }
   0xd   : > { %p307_p10 = scmp.lt.s32.totalorder (!%p273_p9), %s810_s9, 1  ;;  %s541_s17 = scalar_lea.hbm (!%p273_p9), %s960_s8, %s810_s9 }
   0xe   : > { %276 = sbr.rel (%p273_p9) target bundleno = 512 (0x200), region = 52  ;;  %s545_s19 = sshll.u32 (!%p273_p9), %s541_s17, 4  ;;  %s546_s19 = int_to_ptr.hbm [resolvable:$true] %s545_s19 }
   0xf   : > { %s693_s23 = sshra.s32 (!%p273_p9), %s546_s19, 4  ;;  %s699_s26 = scalar_lea.hbm (!%p273_p9), %s960_s8, 2  ;;  %s694_s23 = int_to_ptr.hbm [resolvable:$true] %s693_s23 }
  0x10   : > { %s695_s24 = scalar_lea.hbm (!%p273_p9), %s694_s23, 1  ;;  %p700_p0 = scmp.lt.s32.totalorder (!%p273_p9), %s694_s23, %s960_s8 }
  0x11   : > { %p696_p11 = scmp.ne.s32.totalorder (!%p273_p9), %s694_s23, %s695_s24  ;;  %p701_p1 = scmp.lt.s32.totalorder (!%p273_p9), %s699_s26, %s695_s24 }
  0x13   : > { %v743_v0 = vmov 0   ;;  %v322_v1 = vld [vmem:[%s955_s3 + $0x18] sm:$0xff]  ;;  %v320_v2 = vld [vmem:[%s955_s3 + $0x8] sm:$0xff]  ;;  %s845_s21 = scalar_select %p307_p10, %s810_s9, 1  ;;  %vm356_vm0 = vcmask 1043456   ;;  %v315_v3 = vld [vmem:[%s954_s2] sm:$0xff]  ;;  %v518_v60 = vlaneseq }
  0x14   : > { %672 = vset.pattern.permute.xlu1 %v743_v0  ;;  %671 = vset.pattern.permute.xlu0 %v743_v0  ;;  %vm343_vm1 = vcmask 31744   ;;  %v318_v4 = vld [vmem:[%s954_s2 + $0x18] sm:$0xff]  ;;  %v321_v6 = vld [vmem:[%s955_s3 + $0x10] sm:$0xff]  ;;  %v319_v7 = vld [vmem:[%s955_s3] sm:$0xff]  ;;  %vm421_vm2 = vcmask 261120   ;;  %vm497_vm3 = vcmask 1041408   ;;  %p697_p12 = pnand %p696_p11, %p827_p5  ;;  %p702_p2 = por %p701_p1, %p700_p0 }
  0x15   : > { %340 = vperm.xlu0 %671, %v322_v1   ;;  %330 = vperm.xlu1 %672, %v320_v2   ;;  %s613_s22 = sshll.u32 %s845_s21, 2  ;;  %v316_v8 = vld [vmem:[%s954_s2 + $0x8] sm:$0xff]  ;;  %v397_v10 = vld [vmem:[%s957_s5] sm:$0xff]  ;;  %v317_v11 = vld [vmem:[%s954_s2 + $0x10] sm:$0xff]  ;;  %s963_s10 = scalar_lea.vmem %s953_s1, %s845_s21 }
  0x16   : > { %673 = vset.pattern.permute.xlu2 %v743_v0  ;;  %s310_s12 = scalar_lea.vmem %s952_s0, %s613_s22  ;;  %v398_v9 = vld [vmem:[%s957_s5 + $0x8] sm:$0xff]  ;;  %v400_v13 = vld [vmem:[%s957_s5 + $0x18] sm:$0xff]  ;;  %v399_v20 = vld [vmem:[%s957_s5 + $0x10] sm:$0xff]  ;;  %v519_v0 = vshrl.u32 %v518_v60, 7  ;;  %s305_s21 = sand.u32 1, %s733_s28  }
  0x17   : > { %v314_v5 = vld [vmem:[%s310_s12] sm:$0xf]  ;;  %418 = vperm.xlu2 %673, %v400_v13   ;;  %v395_v32 = vld [vmem:[%s956_s4 + $0x10] sm:$0xff]  ;;  %v394_v33 = vld [vmem:[%s956_s4 + $0x8] sm:$0xff]  ;;  %s306_s25 = scalar_lea.vmem [#allocation2], %s305_s21  ;;  %s533_s20 = scalar_lea.sflag [#allocation3], %s305_s21 }
  0x18   : > { %614 = vmatpush.msk.msra.mxu0 %vm356_vm0, %v314_v5  ;;  %626 = vmatpush.msk.msra.mxu2 %vm356_vm0, %v314_v5  ;;  %v468_v26 = vld [vmem:[%s959_s7] sm:$0x3]  ;;  %v396_v34 = vld [vmem:[%s956_s4 + $0x18] sm:$0xff]  ;;  %s543_s18 = sshll.u32 %s306_s25, 4  ;;  %p698_p13 = pneg %p697_p12  ;;  %s544_s18 = int_to_ptr.vmem [resolvable:$true] %s543_s18 }
  0x19   : > { %615 = vmatmul.msk.f32.vlgmr.msra.gmra.mxu0 %vm343_vm1, %v315_v3  ;;  %618 = vmatmul.msk.f32.vlgmr.msra.gmra.mxu2 %vm343_vm1, %v318_v4  ;;  %v393_v31 = vld [vmem:[%s956_s4] sm:$0xff] }
  0x1a   : > { %v467_v51 = vld [vmem:[%s958_s6] sm:$0x3]  ;;  %p703_p3 = pnand %p702_p2, %p698_p13 }
  0x1b   : > { %v674_v62 = vld [vmem:[%s963_s10] ss:$0 sm:$0xff] }
  0x1c   : > { %vm521_vm4 = vcmp.eq.s32.totalorder %v519_v0, %v674_v62 }
  0x1d   : > { %335 = vperm.xlu0 %671, %v321_v6   ;;  %325 = vperm.xlu1 %672, %v319_v7  }
  0x1f   : > { %413 = vperm.xlu2 %673, %v399_v20  }
  0x21   : > { %616 = vmatmul.msk.f32.gmra.mxu0 %vm343_vm1, %v316_v8 }
  0x25   : > { %408 = vperm.xlu0 %671, %v398_v9   ;;  %403 = vperm.xlu1 %672, %v397_v10  }
  0x27   : > { %471 = vperm.xlu2 %673, %v468_v26  }
  0x29   : > { %617 = vmatmul.msk.f32.gmra.mxu0 %vm343_vm1, %v317_v11 }
  0x71   : > { %v419_v35 = vpop.permute.xlu2 %418 }
  0x79   : > { %v414_v38 = vpop.permute.xlu2 %413 }
  0x81   : > { %v472_v52 = vpop.permute.xlu2 %471 }
  0x87   : > { %v341_v14 = vpop.permute.xlu0 %340  ;;  %v331_v15 = vpop.permute.xlu1 %330 }
  0x8f   : > { %v336_v21 = vpop.permute.xlu0 %335  ;;  %v326_v22 = vpop.permute.xlu1 %325 }
  0x96   : > { %v377_v12 = vpop.f32.mrf.mxu0 }
  0x97   : > { %v378_v27 = vadd.f32 %v377_v12, %v326_v22  ;;  %v409_v43 = vpop.permute.xlu0 %408  ;;  %v404_v46 = vpop.permute.xlu1 %403 }
  0x99   : > { %v389_v30 = vmax.f32 %v378_v27, 0.0 }
  0x9c   : > { %v386_v16 = vpop.f32.mrf.mxu2 }
  0x9d   : > { %v387_v17 = vadd.f32 %v386_v16, %v341_v14 }
  0x9e   : > { %v380_v18 = vpop.f32.mrf.mxu0 }
  0x9f   : > { %v392_v19 = vmax.f32 %v387_v17, 0.0  ;;  %v381_v24 = vadd.f32 %v380_v18, %v331_v15 }
  0xa1   : > { %446 = vmatpush.msra.mxu1 %v392_v19  ;;  %627 = vmatpush.msra.mxu3 %v392_v19  ;;  %v390_v29 = vmax.f32 %v381_v24, 0.0 }
  0xa6   : > { %v383_v23 = vpop.f32.mrf.mxu0 }
  0xa7   : > { %v384_v25 = vadd.f32 %v383_v23, %v336_v21 }
  0xa9   : > { %v391_v28 = vmax.f32 %v384_v25, 0.0 }
  0xab   : > { %447 = vmatpush.msra.mxu1 %v391_v28  ;;  %628 = vmatpush.msra.mxu3 %v391_v28 }
  0xad   : > { %448 = vmatpush.msra.mxu1 %v390_v29  ;;  %629 = vmatpush.msra.mxu3 %v390_v29 }
  0xaf   : > { %449 = vmatpush.msra.mxu1 %v389_v30  ;;  %630 = vmatpush.msra.mxu3 %v389_v30 }
  0xb0   : > { %619 = vmatmul.msk.f32.vlgmr.msra.gmra.mxu1 %vm421_vm2, %v393_v31  ;;  %621 = vmatmul.msk.f32.vlgmr.msra.gmra.mxu3 %vm421_vm2, %v395_v32 }
  0xb8   : > { %620 = vmatmul.msk.f32.gmra.mxu1 %vm421_vm2, %v394_v33  ;;  %622 = vmatmul.msk.f32.gmra.mxu3 %vm421_vm2, %v396_v34 }
 0x12d   : > { %v451_v36 = vpop.f32.mrf.mxu1 }
 0x12e   : > { %v452_v47 = vadd.f32 %v451_v36, %v404_v46 }
 0x130   : > { %v463_v50 = vmax.f32 %v452_v47, 0.0 }
 0x133   : > { %v457_v37 = vpop.f32.mrf.mxu3 }
 0x134   : > { %v458_v41 = vadd.f32 %v457_v37, %v414_v38 }
 0x135   : > { %v454_v39 = vpop.f32.mrf.mxu1 }
 0x136   : > { %v455_v44 = vadd.f32 %v454_v39, %v409_v43  ;;  %v465_v48 = vmax.f32 %v458_v41, 0.0 }
 0x138   : > { %v464_v49 = vmax.f32 %v455_v44, 0.0 }
 0x13b   : > { %v460_v40 = vpop.f32.mrf.mxu3 }
 0x13c   : > { %v461_v42 = vadd.f32 %v460_v40, %v419_v35 }
 0x13e   : > { %v466_v45 = vmax.f32 %v461_v42, 0.0 }
 0x140   : > { %489 = vmatpush.msrb.mxu2 %v466_v45 }
 0x142   : > { %490 = vmatpush.msrb.mxu2 %v465_v48 }
 0x144   : > { %491 = vmatpush.msrb.mxu2 %v464_v49 }
 0x146   : > { %492 = vmatpush.msrb.mxu2 %v463_v50 }
 0x147   : > { %623 = vmatmul.msk.f32.vlgmr.msrb.gmra.mxu2 %vm421_vm2, %v467_v51 }
 0x1ca   : > { %v494_v53 = vpop.f32.mrf.mxu2 }
 0x1cb   : > { %v495_v54 = vadd.f32 %v494_v53, %v472_v52 }
 0x1cd   : > { %v498_v55 = vsel %vm497_vm3, %v495_v54, -inf }
 0x1ce   : > { %v499_v56 = vrot.slane %v498_v55, 4 }
 0x1d0   : > { %v500_v57 = vmax.f32 %v498_v55, %v499_v56 }
 0x1d2   : > { %v501_v58 = vrot.slane %v500_v57, 2 }
 0x1d4   : > { %v502_v59 = vmax.f32 %v500_v57, %v501_v58 }
 0x1d6   : > { %v503_v61 = vrot.slane %v502_v59, 1 }
 0x1d8   : > { %v504_v63 = vmax.f32 %v502_v59, %v503_v61 }
 0x1da   : > { %v505_v1 = vsub.f32 %v495_v54, %v504_v63 }
 0x1dc   : > { %v506_v2 = vmul.f32 1.442695, %v505_v1  ;;  %v522_v3 = vsel %vm521_vm4, %v505_v1, 0.0 }
 0x1dd   : > { %v523_v4 = vsel %vm497_vm3, %v522_v3, 0.0 }
 0x1de   : > { %675 = vpow2.f32 %v506_v2  ;;  %v524_v7 = vrot.slane %v523_v4, 4 }
 0x1e0   : > { %v525_v10 = vadd.f32 %v524_v7, %v523_v4 }
 0x1e2   : > { %v526_v13 = vrot.slane %v525_v10, 2 }
 0x1e4   : > { %v676_v5 = vpop.eup %675  ;;  %v527_v16 = vadd.f32 %v526_v13, %v525_v10 }
 0x1e5   : > { %v508_v6 = vsel %vm497_vm3, %v676_v5, 0.0 }
 0x1e6   : > { %v509_v8 = vrot.slane %v508_v6, 4  ;;  %v528_v17 = vrot.slane %v527_v16, 1 }
 0x1e8   : > { %v510_v9 = vadd.f32 %v509_v8, %v508_v6  ;;  %v529_v20 = vadd.f32 %v528_v17, %v527_v16 }
 0x1ea   : > { %v511_v11 = vrot.slane %v510_v9, 2 }
 0x1ec   : > { %v512_v12 = vadd.f32 %v511_v11, %v510_v9 }
 0x1ee   : > { %v513_v14 = vrot.slane %v512_v12, 1 }
 0x1f0   : > { %v514_v15 = vadd.f32 %v513_v14, %v512_v12 }
 0x1f2   : > { %677 = vlog2.f32 %v514_v15 }
 0x1f8   : > { %v678_v18 = vpop.eup %677 }
 0x1f9   : > { %v516_v19 = vmul.f32 0.6931472, %v678_v18 }
 0x1fb   : > { %v530_v21 = vsub.f32 %v529_v20, %v516_v19 }
 0x1fd   : > { %531 = vst [vmem:[%s306_s25] sm:$0x1] %v530_v21 }
 0x1fe   : > { %706 = shalt.err (!%p703_p3)
}
 0x1ff   : > { %631 = dma.vmem_to_hbm [thread:$0]  (%p827_p5), %s544_s18, 16, %s546_s19, %s533_s20  }
 0x200 PF: > { %p637_p4 = scmp.ge.s32.totalorder %s741_s30, 2  ;;  %s557_s21 = sand.u32 1, %s729_s27  }
 0x201   : > { %s558_s13 = scalar_lea.sflag [#allocation3], %s557_s21 }
 0x202   : > { %p634_p7 = pnand %p637_p4, %p831_p6 }
 0x204   : > { %p635_p8 = pneg %p634_p7 }
 0x206   : > { %724 = dma.done.wait (%p635_p8), %s558_s13, 16  }
 0x207   : > { %726 = vsyncadd (%p635_p8), %s558_s13, 4294967280  ;;  %p18_p9 = scmp.ge.s32.totalorder %s814_s11, 4   ;;  %s964_s27 = smov %s733_s28 }
 0x208   : > { %s965_s28 = smov %s737_s29  ;;  %s966_s29 = smov %s825_s14 }
 0x209   : > { %s967_s30 = smov %s814_s11  ;;  %20 = sbr.rel (!%p18_p9) target bundleno = 3 (0x3), region = 90 }
 0x20e   :  { %563 = vsyncpa [#allocation3], 1 }
 0x20f   :  { %565 = vsyncpa [#allocation3 + $0x1], 1 }

</bundles_post_ra>
